<compile_context>
chip_gen: v7x
topology: tpu7x:2x2x1
jax: 0.10.0
libtpu: 0.0.40
codegen_flags: <defaults>
</compile_context>

<pallas_src>
import math

import jax
import jax.numpy as jnp
from jax.experimental import pallas as pl
from jax.experimental.pallas import tpu as pltpu


def _dmd_kernel(x_ref, sh_ref, o_ref):
    # x_ref  : (H, tb*W)    tb binarized images (exact 0/1) stacked along lanes, bf16
    # sh_ref : (G_h, H)     one-hot(-or-zero) row selection (pad + nearest resize), bf16
    # o_ref  : (G_h, tb*W)  row-selected planes, bf16
    # Every S_h row has at most one 1 and x is exactly 0/1, so the f32 accumulation and
    # the bf16 downcast are bit-exact.
    o_ref[...] = jnp.dot(
        sh_ref[...], x_ref[...], preferred_element_type=jnp.float32
    ).astype(o_ref.dtype)


def _nearest_select(in_size: int, out_size: int, pad_factor: float):
    """Indices/validity for: center-pad `in_size` to floor(in_size*pad_factor), then
    nearest-neighbor resize to `out_size` (PyTorch 'nearest': src = floor(dst*in/out)).

    Output position j reads input index idx[j] when valid[j], else it lies in the
    zero-padded region.  NOTE: for pad_factor < 1 (resize_factor > 1) the padded size
    is smaller than the input, so the selection crops rather than pads (mirrors
    zero_padding with factor < 1)."""
    padded = int(math.floor(in_size * pad_factor))
    pad_left = (padded - in_size) // 2
    src = jnp.floor(jnp.arange(out_size) * (padded / out_size)).astype(jnp.int32)
    rel = src - pad_left
    valid = (rel >= 0) & (rel < in_size)
    return jnp.clip(rel, 0, in_size - 1), valid


def _choose_tb(n_imgs: int, w: int, h: int, g_h: int) -> int:
    """Images packed along lanes per grid step.

    Goals:
      * (tb * w) % 128 == 0  -> lane-dense, unmasked stores (biggest out_spec lever)
      * ~1 MiB of in+out block traffic per step -> amortize ~0.35 us per-step overhead
      * >= 2 grid steps when the batch allows it -> both v7x TensorCores get work
    """
    lane_q = 128 // math.gcd(w, 128)            # smallest tb making tb*w lane-aligned
    per_img = (h + g_h) * w * 2                 # bf16 in + out bytes per image per step
    target = 1 << 20                            # ~1 MiB of block traffic per step
    tb = max(lane_q, (target // per_img) // lane_q * lane_q)
    n_q = lane_q * (-(-n_imgs // lane_q))       # batch rounded up to the lane quantum
    tb = min(tb, n_q)
    if n_q // tb < 2:                           # prefer >= 2 steps (v7x megacore)
        tb_half = (n_q // 2) // lane_q * lane_q
        if tb_half >= lane_q:
            tb = tb_half
    return tb


def dmd_forward(x: jnp.ndarray, grid_num=None, resize_factor: float = 1.0) -> jnp.ndarray:
    """x: (B, C, H, W) float -> (B, C, G_h, G_w) complex64 with 0/1 values."""
    B, C, H, W = x.shape
    pad_factor = 1.0 / resize_factor
    if grid_num is not None:
        g_h = g_w = int(grid_num)
    else:
        # grid_num=None: the reference only zero-pads (no resize). Resizing to the
        # padded size is the identity, so the same selection machinery is exact.
        g_h = int(math.floor(H * pad_factor))
        g_w = int(math.floor(W * pad_factor))

    N = B * C
    tb = _choose_tb(N, W, H, g_h)
    n_pad = tb * (-(-N // tb))

    # Row (H) selection as a one-hot matrix -> single MXU matmul inside the kernel.
    idx_h, valid_h = _nearest_select(H, g_h, pad_factor)
    s_h = jnp.where(valid_h[:, None],
                    jax.nn.one_hot(idx_h, H, dtype=jnp.float32),
                    0.0).astype(jnp.bfloat16)                        # (G_h, H)
    # Column (W) selection stays a static gather + zero-fill in the fused epilogue.
    idx_w, valid_w = _nearest_select(W, g_w, pad_factor)

    # Binarize FIRST (exact: the selections only permute / zero-fill). Compare in f32
    # so values near 0.5 cannot flip; casting exact 0/1 to bf16 is lossless. The where
    # fuses into the packing transpose: xs[h, n*W + w] = binarize(x)[n, h, w].
    xb = jnp.where(x.reshape(N, H, W).astype(jnp.float32) >= 0.5,
                   1.0, 0.0).astype(jnp.bfloat16)
    if n_pad != N:
        xb = jnp.pad(xb, ((0, n_pad - N), (0, 0), (0, 0)))           # zeros stay 0
    xs = jnp.transpose(xb, (1, 0, 2)).reshape(H, n_pad * W)

    out = pl.pallas_call(
        _dmd_kernel,
        out_shape=jax.ShapeDtypeStruct((g_h, n_pad * W), jnp.bfloat16),
        grid=(n_pad // tb,),
        in_specs=[
            pl.BlockSpec((H, tb * W), lambda i: (0, i)),
            pl.BlockSpec((g_h, H), lambda i: (0, 0)),    # constant, VMEM-resident
        ],
        out_specs=pl.BlockSpec((g_h, tb * W), lambda i: (0, i)),
        compiler_params=pltpu.CompilerParams(
            dimension_semantics=("parallel",)),
    )(xs, s_h)

    # Single fused epilogue: un-stack (G_h, n_pad*W) -> (N, G_h, W), nearest-neighbor
    # column gather + zero-fill (the W selection), f32 upcast and complex cast.
    planes = jnp.transpose(out.reshape(g_h, n_pad, W), (1, 0, 2))[:N]      # (N, G_h, W)
    real = jnp.where(valid_w[None, None, :],
                     planes[..., idx_w].astype(jnp.float32),
                     0.0)                                                  # (N, G_h, G_w)
    y = jax.lax.complex(real, jnp.zeros_like(real))
    return y.reshape(B, C, g_h, g_w)


def _dmd_reference(x, grid_num, resize_factor):
    """Pure-JAX reference of the PyTorch forward (real part only)."""
    B, C, H, W = x.shape
    ph = int(math.floor(H / resize_factor))
    pw = int(math.floor(W / resize_factor))
    p_top = (ph - H) // 2
    p_left = (pw - W) // 2
    xp = jnp.zeros((B, C, ph, pw), x.dtype)
    xp = xp.at[:, :, p_top:p_top + H, p_left:p_left + W].set(x)
    if grid_num is not None:
        src_h = jnp.floor(jnp.arange(grid_num) * (ph / grid_num)).astype(jnp.int32)
        src_w = jnp.floor(jnp.arange(grid_num) * (pw / grid_num)).astype(jnp.int32)
        xp = xp[:, :, src_h, :][:, :, :, src_w]
    return jnp.where(xp >= 0.5, 1.0, 0.0)


if __name__ == "__main__":
    key = jax.random.PRNGKey(0)
    B, C, H, W = 2, 4, 16, 16          # small MNIST-like images
    grid_num = 64
    resize_factor = 0.5                # image occupies half of the "DMD screen"

    x = jax.random.uniform(key, (B, C, H, W), dtype=jnp.float32)

    fwd = jax.jit(dmd_forward, static_argnames=("grid_num", "resize_factor"))
    y = fwd(x, grid_num=grid_num, resize_factor=resize_factor)
    y = jax.block_until_ready(y)

    assert y.shape == (B, C, grid_num, grid_num)
    assert y.dtype == jnp.complex64
    yr = jnp.real(y)
    assert bool(jnp.all((yr == 0.0) | (yr == 1.0)))

    ref = _dmd_reference(x, grid_num, resize_factor)
    assert bool(jnp.all(yr == ref)), "kernel output mismatch vs pure-JAX reference"

    print("KERNEL_OK")
</pallas_src>

<mosaic_0001>
module attributes {stable_mosaic.version = 11 : i64} {
  func.func @_dmd_kernel(%arg0: i32, %arg1: memref<16x128xbf16, #tpu.memory_space<vmem>>, %arg2: memref<64x16xbf16, #tpu.memory_space<vmem>>, %arg3: memref<64x128xbf16, #tpu.memory_space<vmem>>) attributes {dimension_semantics = [#tpu.dimension_semantics<parallel>], iteration_bounds = array<i64: 1>, scalar_prefetch = 0 : i64, scratch_operands = 0 : i64, tpu.core_type = #tpu.core_type<tc>, window_params = [{transform_indices = @transform_0, window_bounds = array<i64: 16, 128>}, {pipeline_mode = #tpu.pipeline_mode<synchronous>, transform_indices = @transform_1, window_bounds = array<i64: 64, 16>}, {transform_indices = @transform_2, window_bounds = array<i64: 64, 128>}]} {
    %c0 = arith.constant 0 : index
    %c0_0 = arith.constant 0 : index
    %0 = vector.load %arg2[%c0, %c0_0] : memref<64x16xbf16, #tpu.memory_space<vmem>>, vector<64x16xbf16>
    %c0_1 = arith.constant 0 : index
    %c0_2 = arith.constant 0 : index
    %1 = vector.load %arg1[%c0_1, %c0_2] : memref<16x128xbf16, #tpu.memory_space<vmem>>, vector<16x128xbf16>
    %cst = arith.constant dense<0.000000e+00> : vector<64x128xf32>
    %2 = tpu.matmul %0, %1, %cst {dimension_numbers = #tpu.dot_dimension_numbers<[1], [0], [0], [1], [0, 0, 1, 1], [], []>} : vector<64x16xbf16>, vector<16x128xbf16>, vector<64x128xf32> -> vector<64x128xf32>
    %3 = arith.truncf %2 : vector<64x128xf32> to vector<64x128xbf16>
    %c0_3 = arith.constant 0 : index
    %c0_4 = arith.constant 0 : index
    %4 = vector.load %arg3[%c0_3, %c0_4] : memref<64x128xbf16, #tpu.memory_space<vmem>>, vector<64x128xbf16>
    tpu.vector_store %arg3[%c0_3, %c0_4], %3 {strides = array<i32>} : memref<64x128xbf16, #tpu.memory_space<vmem>>, vector<64x128xbf16>,
    return
  }
  func.func @transform_0(%arg0: i32) -> (i32, i32) {
    %c0_i32 = arith.constant 0 : i32
    %c0_i32_0 = arith.constant 0 : i32
    return %c0_i32, %arg0 : i32, i32
  }
  func.func @transform_1(%arg0: i32) -> (i32, i32) {
    %c0_i32 = arith.constant 0 : i32
    %c0_i32_0 = arith.constant 0 : i32
    %c0_i32_1 = arith.constant 0 : i32
    return %c0_i32, %c0_i32_0 : i32, i32
  }
  func.func @transform_2(%arg0: i32) -> (i32, i32) {
    %c0_i32 = arith.constant 0 : i32
    %c0_i32_0 = arith.constant 0 : i32
    return %c0_i32, %arg0 : i32, i32
  }
}

</mosaic_0001>

<bundles_post_ra>
// kernel: custom-call
= control target key start
LH: loop header
LB: loop body
LE: loop exit
PB: predicated region body
PF: predicated region fallthrough
CT: control target
= control target key end

     0   :  { %s126_s0 = inlined_call_operand.vmem [shape: f32[2,4,64,64], index: 0, kind: input, shape index: {}]   ;;  %s127_s1 = inlined_call_operand.vmem [shape: f32[2,4,64,64], index: 1, kind: input, shape index: {}]   ;;  %s128_s2 = inlined_call_operand.hbm [shape: c64[2,4,64,64], index: 2, kind: output, shape index: {}]  }
   0x1   :  { %s87_s11 = scalar_lea.hbm %s128_s2, 8192 }
   0x2   :  { %4 = vsyncpa [#allocation0], 0  ;;  %s5_s14 = sshll.u32 %s126_s0, 4  ;;  %s6_s14 = int_to_ptr.vmem [resolvable:$true] %s5_s14 }
   0x3   :  { %s18_s15 = scalar_lea.vmem %s6_s14, 8192  ;;  %p23_p1 = scmp.lt.s32.totalorder %s6_s14, %s6_s14 }
   0x4   :  { %p19_p0 = scmp.ne.s32.totalorder %s6_s14, %s18_s15  ;;  %p24_p2 = scmp.lt.s32.totalorder %s18_s15, %s18_s15 }
   0x6   :  { %p25_p3 = por %p24_p2, %p23_p1 }
   0x8   :  { %p26_p4 = pnand %p25_p3, %p19_p0 }
   0xa   :  { %29 = shalt.err (!%p26_p4)  }
   0xb   :  { %p31_p5 = scmp.ne.s32.totalorder %s128_s2, %s87_s11  ;;  %s32_s0 = scalar_lea.hbm %s128_s2, 16384 }
   0xc   :  { %p33_p6 = scmp.lt.u32.totalorder %s32_s0, %s87_s11  ;;  %p34_p7 = scmp.lt.u32.totalorder %s87_s11, %s128_s2 }
   0xe   :  { %p35_p8 = por %p34_p7, %p33_p6 }
  0x10   :  { %p36_p9 = pnand %p35_p8, %p31_p5 }
  0x12   :  { %39 = shalt.err (!%p36_p9)  }
  0x13   :  { %8 = dma.vmem_to_hbm [thread:$0]  %s6_s14, 8192, %s128_s2, [#allocation0] }
  0x14   :  { %65 = dma.done.wait [#allocation0], 8192  }
  0x15   :  { %66 = vsyncadd [#allocation0], 4294959104 }
  0x16   :  { %10 = vsyncpa [#allocation0], 1 }
  0x17   :  { %11 = vsyncpa [#allocation1], 0  ;;  %s12_s28 = sshll.u32 %s127_s1, 4  ;;  %s13_s28 = int_to_ptr.vmem [resolvable:$true] %s12_s28 }
  0x18   :  { %s40_s29 = scalar_lea.vmem %s13_s28, 8192  ;;  %p45_p11 = scmp.lt.s32.totalorder %s13_s28, %s13_s28 }
  0x19   :  { %p41_p10 = scmp.ne.s32.totalorder %s13_s28, %s40_s29  ;;  %p46_p12 = scmp.lt.s32.totalorder %s40_s29, %s40_s29 }
  0x1b   :  { %p47_p13 = por %p46_p12, %p45_p11 }
  0x1d   :  { %p48_p0 = pnand %p47_p13, %p41_p10 }
  0x1f   :  { %51 = shalt.err (!%p48_p0)  }
  0x20   :  { %p53_p1 = scmp.ne.s32.totalorder %s87_s11, %s32_s0  ;;  %p56_p2 = scmp.lt.u32.totalorder %s32_s0, %s32_s0 }
  0x22   :  { %p57_p3 = por %p56_p2, %p34_p7 }
  0x24   :  { %p59_p4 = por %p57_p3, %p33_p6 }
  0x26   :  { %p60_p5 = pnand %p59_p4, %p53_p1 }
  0x28   :  { %63 = shalt.err (!%p60_p5)  }
  0x29   :  { %15 = dma.vmem_to_hbm [thread:$0]  %s13_s28, 8192, %s87_s11, [#allocation1] }
  0x2a   :  { %67 = dma.done.wait [#allocation1], 8192  }
  0x2b   :  { %68 = vsyncadd [#allocation1], 4294959104 }
  0x2c   :  { %17 = vsyncpa [#allocation1], 1 }

// kernel: dmd_forward.1
= control target key start
LH: loop header
LB: loop body
LE: loop exit
PB: predicated region body
PF: predicated region fallthrough
CT: control target
= control target key end

     0   :  { %vm48_vm0 = vcmask 130048   ;;  %s282_s0 = inlined_call_operand.vmem [shape: bf16[16,128], index: 0, kind: input, shape index: {}]   ;;  %s283_s1 = inlined_call_operand.vmem [shape: bf16[64,16], index: 1, kind: input, shape index: {}]   ;;  %s284_s2 = inlined_call_operand.vmem [shape: bf16[64,128], index: 2, kind: output, shape index: {}]  }
   0x1   :  { %v235_v0 = vld [vmem:[%s282_s0] sm:$0xff]   ;;  %v237_v2 = vld [vmem:[%s283_s1 + $0x10] sm:$0xff]   ;;  %v238_v3 = vld [vmem:[%s283_s1 + $0x8] sm:$0xff]  }
   0x2   :  { %v236_v1 = vld [vmem:[%s283_s1] sm:$0xff]   ;;  %223 = vmatprep.subr.bf16.mxu0 %v235_v0  ;;  %233 = vmatprep.subr.bf16.mxu1 %v235_v0  ;;  %v239_v4 = vld [vmem:[%s283_s1 + $0x18] sm:$0xff]  }
   0x3   :  { %224 = vmatpush3.bf16.msra.mxu0 %v235_v0  ;;  %234 = vmatpush3.bf16.msra.mxu1 %v235_v0 }
   0x4   :  { %225 = vmatprep.mubr.msk.bf16.mxu0 %vm48_vm0, %v236_v1  ;;  %229 = vmatprep.mubr.msk.bf16.mxu1 %vm48_vm0, %v237_v2 }
   0x6   :  { %226 = vmatmul.mubr.msk.bf16.vlgmr.msra.gmra.mrb[0].mxu0 %vm48_vm0, %v238_v3  ;;  %230 = vmatmul.mubr.msk.bf16.vlgmr.msra.gmra.mrb[0].mxu1 %vm48_vm0, %v239_v4 }
  0xd9   :  { %v227_v5 = vpop.f32.mrb[0].mxu0  ;;  %v231_v6 = vpop.f32.mrb[0].mxu1 }
  0xda   :  { %v95_v7 = vpop.f32.mrb[1].mxu0  ;;  %v111_v8 = vpop.f32.mrb[1].mxu1 }
  0xdb   :  { %v228_v9 = vpop.f32.mrb[2].mxu0  ;;  %v232_v10 = vpop.f32.mrb[2].mxu1 }
  0xdc   :  { %v203_v11 = vpack.c.bf16 %v228_v9, %v227_v5  ;;  %v213_v12 = vpack.c.bf16 %v232_v10, %v231_v6  ;;  %v98_v13 = vpop.f32.mrb[3].mxu0  ;;  %v114_v14 = vpop.f32.mrb[3].mxu1 }
  0xdd   :  { %v198_v15 = vpack.c.bf16 %v98_v13, %v95_v7  ;;  %v208_v16 = vpack.c.bf16 %v114_v14, %v111_v8 }
  0xde   :  { %215 = vst [vmem:[%s284_s2 + $0x8] sm:$0xff] %v203_v11   ;;  %217 = vst [vmem:[%s284_s2 + $0x18] sm:$0xff] %v213_v12  }
  0xdf   :  { %199 = vst [vmem:[%s284_s2] sm:$0xff] %v198_v15   ;;  %216 = vst [vmem:[%s284_s2 + $0x10] sm:$0xff] %v208_v16  }

</bundles_post_ra>
